<compile_context>
chip_gen: v7x
topology: tpu7x:2x2x1
jax: 0.10.0
libtpu: 0.0.40
codegen_flags: <defaults>
</compile_context>

<pallas_src>
import functools

import jax
import jax.numpy as jnp
from jax.experimental import pallas as pl
from jax.experimental.pallas import tpu as pltpu


def _round_up(x: int, m: int) -> int:
    return ((x + m - 1) // m) * m


def _cdiv(a: int, b: int) -> int:
    return (a + b - 1) // b


def _vmem_capacity_bytes() -> int:
    """Physical VMEM per TensorCore; conservative fallback if query fails."""
    try:
        return int(pltpu.get_tpu_info().vmem_capacity_bytes)
    except Exception:
        return 64 << 20  # v7x per-TC physical (smallest of v5e/v6e/v7x)


# ----------------------------------------------------------------------------
# Fused Pallas kernel: entire ResFNN forward for one batch tile.
#   refs = (w0, b0, w1, b1, ..., wL, bL, out_ref)
#   layer_cfgs[l] = (pre_tanh, leaky, residual)  -- static python config
# ----------------------------------------------------------------------------
def _resfnn_kernel(x_ref, *refs, layer_cfgs):
    out_ref = refs[-1]
    wb_refs = refs[:-1]

    x = x_ref[...].astype(jnp.float32)          # activation carried in f32
    for li, (pre_tanh, leaky, residual) in enumerate(layer_cfgs):
        w = wb_refs[2 * li][...]                # bf16 weight tile (MXU operand)
        b = wb_refs[2 * li + 1][...]            # f32 bias, shape (1, out_pad)
        h = jnp.tanh(x) if pre_tanh else x      # Tanh() before output Linear
        y = jnp.dot(h.astype(jnp.bfloat16), w,
                    preferred_element_type=jnp.float32) + b
        if leaky:                               # nn.LeakyReLU(0.01)
            y = jnp.where(y >= 0, y, 0.01 * y)
        if residual:                            # blocks with in_dim == out_dim
            y = x + y                           # reuse loaded x (no re-read)
        x = y
    out_ref[...] = x.astype(out_ref.dtype)


# ----------------------------------------------------------------------------
# Parameter construction (mimics PyTorch nn.Linear default init) + TPU padding
# ----------------------------------------------------------------------------
def init_resfnn_params(key, input_dim, output_dim, hidden_dims):
    params = []
    in_dim = input_dim
    for d in list(hidden_dims) + [output_dim]:
        key, kw, kb = jax.random.split(key, 3)
        bound = 1.0 / jnp.sqrt(in_dim)
        w = jax.random.uniform(kw, (in_dim, d), jnp.float32, -bound, bound)
        b = jax.random.uniform(kb, (d,), jnp.float32, -bound, bound)
        params.append((w, b))
        in_dim = d
    return params


def pad_params_for_tpu(params, input_dim, hidden_dims, output_dim):
    """Zero-pad features to 128 multiples; weights -> bf16, bias -> (1, out_pad) f32."""
    padded = []
    for w, b in params:
        d_in, d_out = w.shape
        in_p, out_p = _round_up(d_in, 128), _round_up(d_out, 128)
        w_p = jnp.zeros((in_p, out_p), jnp.bfloat16).at[:d_in, :d_out].set(
            w.astype(jnp.bfloat16))
        b_p = jnp.zeros((1, out_p), jnp.float32).at[0, :d_out].set(b)
        padded.append((w_p, b_p))

    cfgs = []
    in_dim = input_dim
    for h in hidden_dims:
        cfgs.append((False, True, in_dim == h))   # Linear + LeakyReLU (+ residual)
        in_dim = h
    cfgs.append((True, False, False))             # Tanh + output Linear
    return padded, tuple(cfgs)


# ----------------------------------------------------------------------------
# Forward wrapper: pad batch/features, launch one fused pallas_call, slice out.
# ----------------------------------------------------------------------------
def resfnn_forward(padded_params, layer_cfgs, x, *, input_dim, output_dim,
                   flatten=False, batch_tile=None):
    if flatten:
        x = x.reshape(x.shape[0], -1)
    batch, in_dim = x.shape
    assert in_dim == input_dim

    in_pad = _round_up(input_dim, 128)
    out_pad = _round_up(output_dim, 128)

    vmem_cap = _vmem_capacity_bytes()
    if batch_tile is None:
        # Bigger tiles on 128 MiB-VMEM generations (v5e/v6e), smaller on v7x.
        batch_tile = 2048 if vmem_cap >= (96 << 20) else 1024
    vmem_limit = max(32 << 20, min(96 << 20, vmem_cap - (8 << 20)))

    # Batch tiling: sublane-aligned, tiles divide the padded batch tightly
    # (no round-up-to-tile blowup), and >=2 grid steps whenever possible so
    # v7x's second TensorCore gets work.
    b_min = _round_up(batch, 8)
    n_tiles = max(2, _cdiv(b_min, batch_tile)) if b_min >= 16 else 1
    tile_b = _round_up(_cdiv(b_min, n_tiles), 8)
    b_pad = tile_b * n_tiles

    # Input stream in bf16 (half the HBM bytes of the previous f32 version).
    x_p = jnp.zeros((b_pad, in_pad), jnp.bfloat16).at[:batch, :input_dim].set(
        x.astype(jnp.bfloat16))

    flat_args = [x_p]
    for w_p, b_p in padded_params:
        flat_args += [w_p, b_p]

    kernel = functools.partial(_resfnn_kernel, layer_cfgs=layer_cfgs)

    def build_in_specs(single_buffer_weights):
        wkw = dict(memory_space=pltpu.MemorySpace.VMEM)
        if single_buffer_weights:
            # Constant index map -> multi-buffering resident weights only
            # wastes VMEM; request a single buffer.
            wkw = dict(wkw, pipeline_mode=pl.Buffered(1))
        specs = [pl.BlockSpec((tile_b, in_pad), lambda i: (i, 0),
                              memory_space=pltpu.MemorySpace.VMEM)]
        for w_p, b_p in padded_params:
            specs.append(pl.BlockSpec(w_p.shape, lambda i: (0, 0), **wkw))
            specs.append(pl.BlockSpec(b_p.shape, lambda i: (0, 0), **wkw))
        return specs

    def launch(single_buffer_weights):
        return pl.pallas_call(
            kernel,
            out_shape=jax.ShapeDtypeStruct((b_pad, out_pad), jnp.bfloat16),
            grid=(b_pad // tile_b,),
            in_specs=build_in_specs(single_buffer_weights),
            out_specs=pl.BlockSpec((tile_b, out_pad), lambda i: (i, 0),
                                   memory_space=pltpu.MemorySpace.VMEM),
            compiler_params=pltpu.CompilerParams(
                dimension_semantics=("parallel",),   # megacore sharding on v7x
                vmem_limit_bytes=vmem_limit,
            ),
        )(*flat_args)

    try:
        out_p = launch(single_buffer_weights=True)
    except Exception:
        # Fallback for jax versions without BlockSpec(pipeline_mode=...):
        # identical kernel with default (double-buffered) resident weights.
        out_p = launch(single_buffer_weights=False)

    # bf16 store stream; restore the module's f32 output dtype after slicing.
    return out_p[:batch, :output_dim].astype(jnp.float32)


# ----------------------------------------------------------------------------
# Pure-JAX float32 reference (matches the PyTorch module semantics)
# ----------------------------------------------------------------------------
def resfnn_reference(params, x, input_dim, hidden_dims, flatten=False):
    if flatten:
        x = x.reshape(x.shape[0], -1)
    in_dim = input_dim
    for i, h in enumerate(hidden_dims):
        w, b = params[i]
        y = x @ w + b
        y = jnp.where(y >= 0, y, 0.01 * y)
        if in_dim == h:
            y = x + y
        x = y
        in_dim = h
    w, b = params[-1]
    return jnp.tanh(x) @ w + b


if __name__ == "__main__":
    batch = 4
    input_dim = 16
    hidden_dims = (32, 32)   # block0: 16->32 (no residual), block1: 32->32 (residual)
    output_dim = 8

    key = jax.random.PRNGKey(0)
    key, kx = jax.random.split(key)
    x = jax.random.normal(kx, (batch, input_dim), jnp.float32)

    params = init_resfnn_params(key, input_dim, output_dim, hidden_dims)
    padded_params, layer_cfgs = pad_params_for_tpu(
        params, input_dim, hidden_dims, output_dim)

    out = resfnn_forward(padded_params, layer_cfgs, x,
                         input_dim=input_dim, output_dim=output_dim,
                         flatten=False)
    out = jax.block_until_ready(out)

    ref = resfnn_reference(params, x, input_dim, hidden_dims, flatten=False)
    assert out.shape == (batch, output_dim)
    # bf16 MXU operands / bf16 I/O streams (f32 accumulate) -> looser tolerance
    # vs the pure-f32 reference.
    assert jnp.allclose(out, ref, atol=5e-2, rtol=5e-2), "mismatch vs reference"

    print("KERNEL_OK")
</pallas_src>

<mosaic_0001>
module attributes {stable_mosaic.version = 11 : i64} {
  func.func @_resfnn_kernel(%arg0: i32, %arg1: memref<8x128xbf16, #tpu.memory_space<vmem>>, %arg2: memref<128x128xbf16, #tpu.memory_space<vmem>>, %arg3: memref<1x128xf32, #tpu.memory_space<vmem>>, %arg4: memref<128x128xbf16, #tpu.memory_space<vmem>>, %arg5: memref<1x128xf32, #tpu.memory_space<vmem>>, %arg6: memref<128x128xbf16, #tpu.memory_space<vmem>>, %arg7: memref<1x128xf32, #tpu.memory_space<vmem>>, %arg8: memref<8x128xbf16, #tpu.memory_space<vmem>>) attributes {dimension_semantics = [#tpu.dimension_semantics<parallel>], iteration_bounds = array<i64: 1>, scalar_prefetch = 0 : i64, scratch_operands = 0 : i64, tpu.core_type = #tpu.core_type<tc>, window_params = [{transform_indices = @transform_0, window_bounds = array<i64: 8, 128>}, {pipeline_mode = #tpu.pipeline_mode<synchronous>, transform_indices = @transform_1, window_bounds = array<i64: 128, 128>}, {pipeline_mode = #tpu.pipeline_mode<synchronous>, transform_indices = @transform_2, window_bounds = array<i64: 1, 128>}, {pipeline_mode = #tpu.pipeline_mode<synchronous>, transform_indices = @transform_3, window_bounds = array<i64: 128, 128>}, {pipeline_mode = #tpu.pipeline_mode<synchronous>, transform_indices = @transform_4, window_bounds = array<i64: 1, 128>}, {pipeline_mode = #tpu.pipeline_mode<synchronous>, transform_indices = @transform_5, window_bounds = array<i64: 128, 128>}, {pipeline_mode = #tpu.pipeline_mode<synchronous>, transform_indices = @transform_6, window_bounds = array<i64: 1, 128>}, {transform_indices = @transform_7, window_bounds = array<i64: 8, 128>}]} {
    %c0 = arith.constant 0 : index
    %c0_0 = arith.constant 0 : index
    %0 = vector.load %arg1[%c0, %c0_0] : memref<8x128xbf16, #tpu.memory_space<vmem>>, vector<8x128xbf16>
    %1 = arith.extf %0 : vector<8x128xbf16> to vector<8x128xf32>
    %c0_1 = arith.constant 0 : index
    %c0_2 = arith.constant 0 : index
    %2 = vector.load %arg2[%c0_1, %c0_2] : memref<128x128xbf16, #tpu.memory_space<vmem>>, vector<128x128xbf16>
    %c0_3 = arith.constant 0 : index
    %c0_4 = arith.constant 0 : index
    %3 = vector.load %arg3[%c0_3, %c0_4] : memref<1x128xf32, #tpu.memory_space<vmem>>, vector<1x128xf32>
    %4 = arith.truncf %1 : vector<8x128xf32> to vector<8x128xbf16>
    %cst = arith.constant dense<0.000000e+00> : vector<8x128xf32>
    %5 = tpu.matmul %4, %2, %cst {dimension_numbers = #tpu.dot_dimension_numbers<[1], [0], [0], [1], [0, 0, 1, 1], [], []>} : vector<8x128xbf16>, vector<128x128xbf16>, vector<8x128xf32> -> vector<8x128xf32>
    %6 = vector.broadcast %3 : vector<1x128xf32> to vector<8x128xf32>
    %7 = arith.addf %5, %6 : vector<8x128xf32>
    %cst_5 = arith.constant 0.000000e+00 : f32
    %8 = vector.broadcast %cst_5 : f32 to vector<8x128xf32>
    %9 = arith.cmpf oge, %7, %8 : vector<8x128xf32>
    %cst_6 = arith.constant 0.00999999977 : f32
    %10 = vector.broadcast %cst_6 : f32 to vector<8x128xf32>
    %11 = arith.mulf %10, %7 : vector<8x128xf32>
    %12 = arith.select %9, %7, %11 : vector<8x128xi1>, vector<8x128xf32>
    %c0_7 = arith.constant 0 : index
    %c0_8 = arith.constant 0 : index
    %13 = vector.load %arg4[%c0_7, %c0_8] : memref<128x128xbf16, #tpu.memory_space<vmem>>, vector<128x128xbf16>
    %c0_9 = arith.constant 0 : index
    %c0_10 = arith.constant 0 : index
    %14 = vector.load %arg5[%c0_9, %c0_10] : memref<1x128xf32, #tpu.memory_space<vmem>>, vector<1x128xf32>
    %15 = arith.truncf %12 : vector<8x128xf32> to vector<8x128xbf16>
    %cst_11 = arith.constant dense<0.000000e+00> : vector<8x128xf32>
    %16 = tpu.matmul %15, %13, %cst_11 {dimension_numbers = #tpu.dot_dimension_numbers<[1], [0], [0], [1], [0, 0, 1, 1], [], []>} : vector<8x128xbf16>, vector<128x128xbf16>, vector<8x128xf32> -> vector<8x128xf32>
    %17 = vector.broadcast %14 : vector<1x128xf32> to vector<8x128xf32>
    %18 = arith.addf %16, %17 : vector<8x128xf32>
    %cst_12 = arith.constant 0.000000e+00 : f32
    %19 = vector.broadcast %cst_12 : f32 to vector<8x128xf32>
    %20 = arith.cmpf oge, %18, %19 : vector<8x128xf32>
    %cst_13 = arith.constant 0.00999999977 : f32
    %21 = vector.broadcast %cst_13 : f32 to vector<8x128xf32>
    %22 = arith.mulf %21, %18 : vector<8x128xf32>
    %23 = arith.select %20, %18, %22 : vector<8x128xi1>, vector<8x128xf32>
    %24 = arith.addf %12, %23 : vector<8x128xf32>
    %c0_14 = arith.constant 0 : index
    %c0_15 = arith.constant 0 : index
    %25 = vector.load %arg6[%c0_14, %c0_15] : memref<128x128xbf16, #tpu.memory_space<vmem>>, vector<128x128xbf16>
    %c0_16 = arith.constant 0 : index
    %c0_17 = arith.constant 0 : index
    %26 = vector.load %arg7[%c0_16, %c0_17] : memref<1x128xf32, #tpu.memory_space<vmem>>, vector<1x128xf32>
    %27 = math.tanh %24 : vector<8x128xf32>
    %28 = arith.truncf %27 : vector<8x128xf32> to vector<8x128xbf16>
    %cst_18 = arith.constant dense<0.000000e+00> : vector<8x128xf32>
    %29 = tpu.matmul %28, %25, %cst_18 {dimension_numbers = #tpu.dot_dimension_numbers<[1], [0], [0], [1], [0, 0, 1, 1], [], []>} : vector<8x128xbf16>, vector<128x128xbf16>, vector<8x128xf32> -> vector<8x128xf32>
    %30 = vector.broadcast %26 : vector<1x128xf32> to vector<8x128xf32>
    %31 = arith.addf %29, %30 : vector<8x128xf32>
    %32 = arith.truncf %31 : vector<8x128xf32> to vector<8x128xbf16>
    %c0_19 = arith.constant 0 : index
    %c0_20 = arith.constant 0 : index
    %33 = vector.load %arg8[%c0_19, %c0_20] : memref<8x128xbf16, #tpu.memory_space<vmem>>, vector<8x128xbf16>
    tpu.vector_store %arg8[%c0_19, %c0_20], %32 {strides = array<i32>} : memref<8x128xbf16, #tpu.memory_space<vmem>>, vector<8x128xbf16>,
    return
  }
  func.func @transform_0(%arg0: i32) -> (i32, i32) {
    %c0_i32 = arith.constant 0 : i32
    %c0_i32_0 = arith.constant 0 : i32
    return %arg0, %c0_i32 : i32, i32
  }
  func.func @transform_1(%arg0: i32) -> (i32, i32) {
    %c0_i32 = arith.constant 0 : i32
    %c0_i32_0 = arith.constant 0 : i32
    %c0_i32_1 = arith.constant 0 : i32
    return %c0_i32, %c0_i32_0 : i32, i32
  }
  func.func @transform_2(%arg0: i32) -> (i32, i32) {
    %c0_i32 = arith.constant 0 : i32
    %c0_i32_0 = arith.constant 0 : i32
    %c0_i32_1 = arith.constant 0 : i32
    return %c0_i32, %c0_i32_0 : i32, i32
  }
  func.func @transform_3(%arg0: i32) -> (i32, i32) {
    %c0_i32 = arith.constant 0 : i32
    %c0_i32_0 = arith.constant 0 : i32
    %c0_i32_1 = arith.constant 0 : i32
    return %c0_i32, %c0_i32_0 : i32, i32
  }
  func.func @transform_4(%arg0: i32) -> (i32, i32) {
    %c0_i32 = arith.constant 0 : i32
    %c0_i32_0 = arith.constant 0 : i32
    %c0_i32_1 = arith.constant 0 : i32
    return %c0_i32, %c0_i32_0 : i32, i32
  }
  func.func @transform_5(%arg0: i32) -> (i32, i32) {
    %c0_i32 = arith.constant 0 : i32
    %c0_i32_0 = arith.constant 0 : i32
    %c0_i32_1 = arith.constant 0 : i32
    return %c0_i32, %c0_i32_0 : i32, i32
  }
  func.func @transform_6(%arg0: i32) -> (i32, i32) {
    %c0_i32 = arith.constant 0 : i32
    %c0_i32_0 = arith.constant 0 : i32
    %c0_i32_1 = arith.constant 0 : i32
    return %c0_i32, %c0_i32_0 : i32, i32
  }
  func.func @transform_7(%arg0: i32) -> (i32, i32) {
    %c0_i32 = arith.constant 0 : i32
    %c0_i32_0 = arith.constant 0 : i32
    return %arg0, %c0_i32 : i32, i32
  }
}

module attributes {stable_mosaic.version = 11 : i64} {
  func.func @_resfnn_kernel(%arg0: i32, %arg1: memref<8x128xbf16, #tpu.memory_space<vmem>>, %arg2: memref<128x128xbf16, #tpu.memory_space<vmem>>, %arg3: memref<1x128xf32, #tpu.memory_space<vmem>>, %arg4: memref<128x128xbf16, #tpu.memory_space<vmem>>, %arg5: memref<1x128xf32, #tpu.memory_space<vmem>>, %arg6: memref<128x128xbf16, #tpu.memory_space<vmem>>, %arg7: memref<1x128xf32, #tpu.memory_space<vmem>>, %arg8: memref<8x128xbf16, #tpu.memory_space<vmem>>) attributes {dimension_semantics = [#tpu.dimension_semantics<parallel>], iteration_bounds = array<i64: 1>, scalar_prefetch = 0 : i64, scratch_operands = 0 : i64, tpu.core_type = #tpu.core_type<tc>, window_params = [{transform_indices = @transform_0, window_bounds = array<i64: 8, 128>}, {pipeline_mode = #tpu.pipeline_mode<synchronous>, transform_indices = @transform_1, window_bounds = array<i64: 128, 128>}, {pipeline_mode = #tpu.pipeline_mode<synchronous>, transform_indices = @transform_2, window_bounds = array<i64: 1, 128>}, {pipeline_mode = #tpu.pipeline_mode<synchronous>, transform_indices = @transform_3, window_bounds = array<i64: 128, 128>}, {pipeline_mode = #tpu.pipeline_mode<synchronous>, transform_indices = @transform_4, window_bounds = array<i64: 1, 128>}, {pipeline_mode = #tpu.pipeline_mode<synchronous>, transform_indices = @transform_5, window_bounds = array<i64: 128, 128>}, {pipeline_mode = #tpu.pipeline_mode<synchronous>, transform_indices = @transform_6, window_bounds = array<i64: 1, 128>}, {transform_indices = @transform_7, window_bounds = array<i64: 8, 128>}]} {
    %c0 = arith.constant 0 : index
    %c0_0 = arith.constant 0 : index
    %0 = vector.load %arg1[%c0, %c0_0] : memref<8x128xbf16, #tpu.memory_space<vmem>>, vector<8x128xbf16>
    %1 = arith.extf %0 : vector<8x128xbf16> to vector<8x128xf32>
    %c0_1 = arith.constant 0 : index
    %c0_2 = arith.constant 0 : index
    %2 = vector.load %arg2[%c0_1, %c0_2] : memref<128x128xbf16, #tpu.memory_space<vmem>>, vector<128x128xbf16>
    %c0_3 = arith.constant 0 : index
    %c0_4 = arith.constant 0 : index
    %3 = vector.load %arg3[%c0_3, %c0_4] : memref<1x128xf32, #tpu.memory_space<vmem>>, vector<1x128xf32>
    %4 = arith.truncf %1 : vector<8x128xf32> to vector<8x128xbf16>
    %cst = arith.constant dense<0.000000e+00> : vector<8x128xf32>
    %5 = tpu.matmul %4, %2, %cst {dimension_numbers = #tpu.dot_dimension_numbers<[1], [0], [0], [1], [0, 0, 1, 1], [], []>} : vector<8x128xbf16>, vector<128x128xbf16>, vector<8x128xf32> -> vector<8x128xf32>
    %6 = vector.broadcast %3 : vector<1x128xf32> to vector<8x128xf32>
    %7 = arith.addf %5, %6 : vector<8x128xf32>
    %cst_5 = arith.constant 0.000000e+00 : f32
    %8 = vector.broadcast %cst_5 : f32 to vector<8x128xf32>
    %9 = arith.cmpf oge, %7, %8 : vector<8x128xf32>
    %cst_6 = arith.constant 0.00999999977 : f32
    %10 = vector.broadcast %cst_6 : f32 to vector<8x128xf32>
    %11 = arith.mulf %10, %7 : vector<8x128xf32>
    %12 = arith.select %9, %7, %11 : vector<8x128xi1>, vector<8x128xf32>
    %c0_7 = arith.constant 0 : index
    %c0_8 = arith.constant 0 : index
    %13 = vector.load %arg4[%c0_7, %c0_8] : memref<128x128xbf16, #tpu.memory_space<vmem>>, vector<128x128xbf16>
    %c0_9 = arith.constant 0 : index
    %c0_10 = arith.constant 0 : index
    %14 = vector.load %arg5[%c0_9, %c0_10] : memref<1x128xf32, #tpu.memory_space<vmem>>, vector<1x128xf32>
    %15 = arith.truncf %12 : vector<8x128xf32> to vector<8x128xbf16>
    %cst_11 = arith.constant dense<0.000000e+00> : vector<8x128xf32>
    %16 = tpu.matmul %15, %13, %cst_11 {dimension_numbers = #tpu.dot_dimension_numbers<[1], [0], [0], [1], [0, 0, 1, 1], [], []>} : vector<8x128xbf16>, vector<128x128xbf16>, vector<8x128xf32> -> vector<8x128xf32>
    %17 = vector.broadcast %14 : vector<1x128xf32> to vector<8x128xf32>
    %18 = arith.addf %16, %17 : vector<8x128xf32>
    %cst_12 = arith.constant 0.000000e+00 : f32
    %19 = vector.broadcast %cst_12 : f32 to vector<8x128xf32>
    %20 = arith.cmpf oge, %18, %19 : vector<8x128xf32>
    %cst_13 = arith.constant 0.00999999977 : f32
    %21 = vector.broadcast %cst_13 : f32 to vector<8x128xf32>
    %22 = arith.mulf %21, %18 : vector<8x128xf32>
    %23 = arith.select %20, %18, %22 : vector<8x128xi1>, vector<8x128xf32>
    %24 = arith.addf %12, %23 : vector<8x128xf32>
    %c0_14 = arith.constant 0 : index
    %c0_15 = arith.constant 0 : index
    %25 = vector.load %arg6[%c0_14, %c0_15] : memref<128x128xbf16, #tpu.memory_space<vmem>>, vector<128x128xbf16>
    %c0_16 = arith.constant 0 : index
    %c0_17 = arith.constant 0 : index
    %26 = vector.load %arg7[%c0_16, %c0_17] : memref<1x128xf32, #tpu.memory_space<vmem>>, vector<1x128xf32>
    %27 = math.tanh %24 : vector<8x128xf32>
    %28 = arith.truncf %27 : vector<8x128xf32> to vector<8x128xbf16>
    %cst_18 = arith.constant dense<0.000000e+00> : vector<8x128xf32>
    %29 = tpu.matmul %28, %25, %cst_18 {dimension_numbers = #tpu.dot_dimension_numbers<[1], [0], [0], [1], [0, 0, 1, 1], [], []>} : vector<8x128xbf16>, vector<128x128xbf16>, vector<8x128xf32> -> vector<8x128xf32>
    %30 = vector.broadcast %26 : vector<1x128xf32> to vector<8x128xf32>
    %31 = arith.addf %29, %30 : vector<8x128xf32>
    %32 = arith.truncf %31 : vector<8x128xf32> to vector<8x128xbf16>
    %c0_19 = arith.constant 0 : index
    %c0_20 = arith.constant 0 : index
    %33 = vector.load %arg8[%c0_19, %c0_20] : memref<8x128xbf16, #tpu.memory_space<vmem>>, vector<8x128xbf16>
    tpu.vector_store %arg8[%c0_19, %c0_20], %32 {strides = array<i32>} : memref<8x128xbf16, #tpu.memory_space<vmem>>, vector<8x128xbf16>,
    return
  }
  func.func @transform_0(%arg0: i32) -> (i32, i32) {
    %c0_i32 = arith.constant 0 : i32
    %c0_i32_0 = arith.constant 0 : i32
    return %arg0, %c0_i32 : i32, i32
  }
  func.func @transform_1(%arg0: i32) -> (i32, i32) {
    %c0_i32 = arith.constant 0 : i32
    %c0_i32_0 = arith.constant 0 : i32
    %c0_i32_1 = arith.constant 0 : i32
    return %c0_i32, %c0_i32_0 : i32, i32
  }
  func.func @transform_2(%arg0: i32) -> (i32, i32) {
    %c0_i32 = arith.constant 0 : i32
    %c0_i32_0 = arith.constant 0 : i32
    %c0_i32_1 = arith.constant 0 : i32
    return %c0_i32, %c0_i32_0 : i32, i32
  }
  func.func @transform_3(%arg0: i32) -> (i32, i32) {
    %c0_i32 = arith.constant 0 : i32
    %c0_i32_0 = arith.constant 0 : i32
    %c0_i32_1 = arith.constant 0 : i32
    return %c0_i32, %c0_i32_0 : i32, i32
  }
  func.func @transform_4(%arg0: i32) -> (i32, i32) {
    %c0_i32 = arith.constant 0 : i32
    %c0_i32_0 = arith.constant 0 : i32
    %c0_i32_1 = arith.constant 0 : i32
    return %c0_i32, %c0_i32_0 : i32, i32
  }
  func.func @transform_5(%arg0: i32) -> (i32, i32) {
    %c0_i32 = arith.constant 0 : i32
    %c0_i32_0 = arith.constant 0 : i32
    %c0_i32_1 = arith.constant 0 : i32
    return %c0_i32, %c0_i32_0 : i32, i32
  }
  func.func @transform_6(%arg0: i32) -> (i32, i32) {
    %c0_i32 = arith.constant 0 : i32
    %c0_i32_0 = arith.constant 0 : i32
    %c0_i32_1 = arith.constant 0 : i32
    return %c0_i32, %c0_i32_0 : i32, i32
  }
  func.func @transform_7(%arg0: i32) -> (i32, i32) {
    %c0_i32 = arith.constant 0 : i32
    %c0_i32_0 = arith.constant 0 : i32
    return %arg0, %c0_i32 : i32, i32
  }
}

</mosaic_0001>

<bundles_post_ra>
// kernel: tpu_custom_call.1
= control target key start
LH: loop header
LB: loop body
LE: loop exit
PB: predicated region body
PF: predicated region fallthrough
CT: control target
= control target key end

     0   :  { %12 = vsyncpa [#allocation3], 0  ;;  %s868_s0 = inlined_call_operand.hbm [shape: bf16[8,128], index: 0, kind: input, shape index: {}]   ;;  %s869_s1 = inlined_call_operand.hbm [shape: bf16[128,128], index: 1, kind: input, shape index: {}]   ;;  %s870_s2 = inlined_call_operand.vmem [shape: f32[1,128], index: 2, kind: input, shape index: {}]   ;;  %s871_s3 = inlined_call_operand.hbm [shape: bf16[128,128], index: 3, kind: input, shape index: {}]   ;;  %s872_s4 = inlined_call_operand.vmem [shape: f32[1,128], index: 4, kind: input, shape index: {}]   ;;  %s873_s5 = inlined_call_operand.hbm [shape: bf16[128,128], index: 5, kind: input, shape index: {}]   ;;  %s874_s6 = inlined_call_operand.vmem [shape: f32[1,128], index: 6, kind: input, shape index: {}]   ;;  %s875_s7 = inlined_call_operand.hbm [shape: bf16[8,128], index: 7, kind: output, shape index: {}]  }
   0x1   :  { %13 = vsyncpa [#allocation6], 0 }
   0x2   :  { %14 = vsyncpa [#allocation9], 0 }
   0x3   :  { %15 = vsyncpa [#allocation4], 0  ;;  %s711_s24 = smov [#allocation5]   ;;  %s593_s28 = scalar_lea.hbm %s869_s1, 1024 }
   0x4   :  { %s31_s25 = sshll.u32 %s711_s24, 4  ;;  %p594_p0 = scmp.ne.s32.totalorder %s869_s1, %s593_s28  ;;  %s32_s25 = int_to_ptr.vmem [resolvable:$true] %s31_s25 }
   0x5   :  { %p597_p1 = scmp.lt.u32.totalorder %s593_s28, %s869_s1 }
   0x7   :  { %p599_p2 = pnand %p597_p1, %p594_p0 }
   0x9   :  { %602 = shalt.err (!%p599_p2)
}
   0xa   :  { %s603_s10 = scalar_lea.vmem %s32_s25, 1024  ;;  %p608_p4 = scmp.lt.s32.totalorder %s32_s25, %s32_s25 }
   0xb   :  { %p604_p3 = scmp.ne.s32.totalorder %s32_s25, %s603_s10  ;;  %p609_p5 = scmp.lt.s32.totalorder %s603_s10, %s603_s10 }
   0xd   :  { %p610_p6 = por %p609_p5, %p608_p4 }
   0xf   :  { %p611_p7 = pnand %p610_p6, %p604_p3 }
  0x11   :  { %614 = shalt.err (!%p611_p7)
}
  0x12   :  { %s712_s11 = smov 64   ;;  %s713_s12 = smov 4  }
  0x13   :  { %37 = dma.hbm_to_vmem [thread:$0]  %s869_s1, 1024, %s32_s25, [#allocation6], %s712_s11, %s712_s11, %s713_s12  }
  0x14   :  { %s714_s15 = smov [#allocation2]   ;;  %s715_s17 = smov [#allocation7]  }
  0x15   :  { %s22_s16 = sshll.u32 %s714_s15, 4  ;;  %s45_s18 = sshll.u32 %s715_s17, 4  ;;  %s23_s16 = int_to_ptr.vmem [resolvable:$true] %s22_s16  ;;  %s46_s18 = int_to_ptr.vmem [resolvable:$true] %s45_s18 }
  0x16   :  { %s615_s21 = scalar_lea.hbm %s868_s0, 64 }
  0x17   :  { %p616_p8 = scmp.ne.s32.totalorder %s868_s0, %s615_s21  ;;  %p619_p9 = scmp.lt.u32.totalorder %s615_s21, %s868_s0 }
  0x19   :  { %p621_p10 = pnand %p619_p9, %p616_p8 }
  0x1b   :  { %624 = shalt.err (!%p621_p10)
}
  0x1c   :  { %s625_s1 = scalar_lea.vmem %s23_s16, 64  ;;  %p630_p12 = scmp.lt.s32.totalorder %s23_s16, %s23_s16 }
  0x1d   :  { %p626_p11 = scmp.ne.s32.totalorder %s23_s16, %s625_s1  ;;  %p631_p13 = scmp.lt.s32.totalorder %s625_s1, %s625_s1 }
  0x1f   :  { %p632_p0 = por %p631_p13, %p630_p12 }
  0x21   :  { %p633_p1 = pnand %p632_p0, %p626_p11 }
  0x23   :  { %636 = shalt.err (!%p633_p1)
}
  0x24   :  { %25 = dma.hbm_to_vmem [thread:$0]  %s868_s0, 64, %s23_s16, [#allocation3]  }
  0x25   :  { %s637_s30 = scalar_lea.hbm %s871_s3, 1024 }
  0x26   :  { %p638_p2 = scmp.ne.s32.totalorder %s871_s3, %s637_s30  ;;  %p641_p3 = scmp.lt.u32.totalorder %s637_s30, %s871_s3 }
  0x28   :  { %p643_p4 = pnand %p641_p3, %p638_p2 }
  0x2a   :  { %646 = shalt.err (!%p643_p4)
}
  0x2b   :  { %s647_s14 = scalar_lea.vmem %s46_s18, 1024  ;;  %p652_p6 = scmp.lt.s32.totalorder %s46_s18, %s46_s18 }
  0x2c   :  { %p648_p5 = scmp.ne.s32.totalorder %s46_s18, %s647_s14  ;;  %p653_p7 = scmp.lt.s32.totalorder %s647_s14, %s647_s14 }
  0x2e   :  { %p654_p8 = por %p653_p7, %p652_p6 }
  0x30   :  { %p655_p9 = pnand %p654_p8, %p648_p5 }
  0x32   :  { %658 = shalt.err (!%p655_p9)
}
  0x33   :  { %51 = dma.hbm_to_vmem [thread:$0]  %s871_s3, 1024, %s46_s18, [#allocation6], %s712_s11, %s712_s11, %s713_s12  }
  0x34   :  { %s716_s16 = smov [#allocation8]   ;;  %s659_s21 = scalar_lea.hbm %s873_s5, 1024 }
  0x35   :  { %s59_s17 = sshll.u32 %s716_s16, 4  ;;  %p660_p10 = scmp.ne.s32.totalorder %s873_s5, %s659_s21  ;;  %s60_s17 = int_to_ptr.vmem [resolvable:$true] %s59_s17 }
  0x36   :  { %p663_p11 = scmp.lt.u32.totalorder %s659_s21, %s873_s5 }
  0x38   :  { %p665_p12 = pnand %p663_p11, %p660_p10 }
  0x3a   :  { %668 = shalt.err (!%p665_p12)
}
  0x3b   :  { %s669_s1 = scalar_lea.vmem %s60_s17, 1024  ;;  %p674_p0 = scmp.lt.s32.totalorder %s60_s17, %s60_s17 }
  0x3c   :  { %p670_p13 = scmp.ne.s32.totalorder %s60_s17, %s669_s1  ;;  %p675_p1 = scmp.lt.s32.totalorder %s669_s1, %s669_s1 }
  0x3e   :  { %p676_p2 = por %p675_p1, %p674_p0 }
  0x40   :  { %p677_p3 = pnand %p676_p2, %p670_p13 }
  0x42   :  { %680 = shalt.err (!%p677_p3)
}
  0x43   :  { %65 = dma.hbm_to_vmem [thread:$0]  %s873_s5, 1024, %s60_s17, [#allocation9], %s712_s11, %s712_s11, %s713_s12  }
  0x44   :  { %703 = dma.done.wait [#allocation3], 64  }
  0x45   :  { %704 = vsyncadd [#allocation3], 4294967232 }
  0x46   :  { %705 = dma.done.wait [#allocation6], 2048  }
  0x47   :  { %706 = vsyncadd [#allocation6], 4294965248 }
  0x48   :  { %707 = dma.done.wait [#allocation9], 1024  }
  0x49   :  { %708 = vsyncadd [#allocation9], 4294966272  ;;  %v717_v0 = vmov 0.0   ;;  %vm718_vm0 = vmmov 0   ;;  %v567_v1 = vld [vmem:[#allocation5] sm:$0xff]   ;;  %v568_v2 = vld [vmem:[#allocation5 + $0x8] sm:$0xff]  }
  0x4a   :  { %498 = vmatprep.subr.bf16.mxu0 %v717_v0  ;;  %514 = vmatprep.mubr.msk.bf16.mxu0 %vm718_vm0, %v717_v0  ;;  %v569_v3 = vld [vmem:[#allocation5 + $0x10] sm:$0xff]   ;;  %v575_v4 = vld [vmem:[#allocation7] sm:$0xff]   ;;  %v570_v5 = vld [vmem:[#allocation5 + $0x18] sm:$0xff]   ;;  %s719_s28 = smov [#allocation10]  }
  0x4b   :  { %518 = vmatprep.subr.bf16.mxu1 %v717_v0  ;;  %534 = vmatprep.mubr.msk.bf16.mxu1 %vm718_vm0, %v717_v0  ;;  %v576_v6 = vld [vmem:[#allocation7 + $0x8] sm:$0xff]   ;;  %v571_v7 = vld [vmem:[#allocation5 + $0x20] sm:$0xff]   ;;  %v577_v8 = vld [vmem:[#allocation7 + $0x10] sm:$0xff]  }
  0x4c   :  { %499 = vmatpush3.bf16.msra.mxu0 %v567_v1  ;;  %519 = vmatpush3.bf16.msra.mxu1 %v575_v4  ;;  %v572_v9 = vld [vmem:[#allocation5 + $0x28] sm:$0xff]   ;;  %v578_v10 = vld [vmem:[#allocation7 + $0x18] sm:$0xff]   ;;  %v573_v11 = vld [vmem:[#allocation5 + $0x30] sm:$0xff]  }
  0x4d   :  { %500 = vmatprep.subr.bf16.mxu0 %v717_v0  ;;  %520 = vmatprep.subr.bf16.mxu1 %v717_v0  ;;  %v579_v12 = vld [vmem:[#allocation7 + $0x20] sm:$0xff]   ;;  %v574_v13 = vld [vmem:[#allocation5 + $0x38] sm:$0xff]   ;;  %v580_v14 = vld [vmem:[#allocation7 + $0x28] sm:$0xff]  }
  0x4e   :  { %v81_v15 = vld [vmem:[#allocation2] sm:$0xf]  ;;  %v581_v16 = vld [vmem:[#allocation7 + $0x30] sm:$0xff]   ;;  %v583_v18 = vld [vmem:[#allocation8] sm:$0xff]  }
  0x4f   :  { %v582_v17 = vld [vmem:[#allocation7 + $0x38] sm:$0xff]   ;;  %v584_v19 = vld [vmem:[#allocation8 + $0x8] sm:$0xff]   ;;  %v585_v20 = vld [vmem:[#allocation8 + $0x10] sm:$0xff]  }
  0x50   :  { %501 = vmatpush3.bf16.msra.mxu0 %v568_v2  ;;  %521 = vmatpush3.bf16.msra.mxu1 %v576_v6  ;;  %v444_v21 = vld [vmem:[%s870_s2] ss:$0 sm:$0xff]  ;;  %v587_v31 = vld [vmem:[#allocation8 + $0x20] sm:$0xff]   ;;  %v588_v32 = vld [vmem:[#allocation8 + $0x28] sm:$0xff]  }
  0x51   :  { %502 = vmatprep.subr.bf16.mxu0 %v717_v0  ;;  %522 = vmatprep.subr.bf16.mxu1 %v717_v0  ;;  %v586_v30 = vld [vmem:[#allocation8 + $0x18] sm:$0xff]   ;;  %v589_v33 = vld [vmem:[#allocation8 + $0x30] sm:$0xff]  }
  0x52   :  { %v590_v34 = vld [vmem:[#allocation8 + $0x38] sm:$0xff]  }
  0x53   :  { %v453_v35 = vld [vmem:[%s872_s4] ss:$0 sm:$0xff]  ;;  %s433_s4 = sshll.u32 %s719_s28, 4  ;;  %s434_s4 = int_to_ptr.vmem [resolvable:$true] %s433_s4 }
  0x54   :  { %503 = vmatpush3.bf16.msra.mxu0 %v569_v3  ;;  %523 = vmatpush3.bf16.msra.mxu1 %v577_v8  ;;  %v462_v46 = vld [vmem:[%s874_s6] ss:$0 sm:$0xff]  ;;  %s681_s29 = scalar_lea.vmem %s434_s4, 64  ;;  %p686_p5 = scmp.lt.s32.totalorder %s434_s4, %s434_s4 }
  0x55   :  { %504 = vmatprep.subr.bf16.mxu0 %v717_v0  ;;  %524 = vmatprep.subr.bf16.mxu1 %v717_v0  ;;  %p682_p4 = scmp.ne.s32.totalorder %s434_s4, %s681_s29  ;;  %p687_p6 = scmp.lt.s32.totalorder %s681_s29, %s681_s29 }
  0x57   :  { %p688_p7 = por %p687_p6, %p686_p5 }
  0x58   :  { %505 = vmatpush3.bf16.msra.mxu0 %v570_v5  ;;  %525 = vmatpush3.bf16.msra.mxu1 %v578_v10 }
  0x59   :  { %506 = vmatprep.subr.bf16.mxu0 %v717_v0  ;;  %526 = vmatprep.subr.bf16.mxu1 %v717_v0  ;;  %p689_p8 = pnand %p688_p7, %p682_p4 }
  0x5c   :  { %507 = vmatpush3.bf16.msra.mxu0 %v571_v7  ;;  %527 = vmatpush3.bf16.msra.mxu1 %v579_v12 }
  0x5d   :  { %508 = vmatprep.subr.bf16.mxu0 %v717_v0  ;;  %528 = vmatprep.subr.bf16.mxu1 %v717_v0 }
  0x60   :  { %509 = vmatpush3.bf16.msra.mxu0 %v572_v9  ;;  %529 = vmatpush3.bf16.msra.mxu1 %v580_v14 }
  0x61   :  { %510 = vmatprep.subr.bf16.mxu0 %v717_v0  ;;  %530 = vmatprep.subr.bf16.mxu1 %v717_v0 }
  0x64   :  { %511 = vmatpush3.bf16.msra.mxu0 %v573_v11  ;;  %531 = vmatpush3.bf16.msra.mxu1 %v581_v16 }
  0x65   :  { %512 = vmatprep.subr.bf16.mxu0 %v717_v0  ;;  %532 = vmatprep.subr.bf16.mxu1 %v717_v0 }
  0x68   :  { %513 = vmatpush3.bf16.msra.mxu0 %v574_v13  ;;  %533 = vmatpush3.bf16.msra.mxu1 %v582_v17 }
  0x69   :  { %538 = vmatprep.subr.bf16.mxu0 %v717_v0 }
  0x6b   :  { %515 = vmatmul.mubr.bf16.vlgmr.msra.gmra.mrb[0].mxu0 %v81_v15 }
  0x6c   :  { %554 = vmatprep.mubr.msk.bf16.mxu0 %vm718_vm0, %v717_v0  ;;  %539 = vmatpush3.bf16.msra.mxu0 %v583_v18 }
  0x6d   :  { %540 = vmatprep.subr.bf16.mxu0 %v717_v0 }
  0x70   :  { %541 = vmatpush3.bf16.msra.mxu0 %v584_v19 }
  0x71   :  { %542 = vmatprep.subr.bf16.mxu0 %v717_v0 }
  0x74   :  { %543 = vmatpush3.bf16.msra.mxu0 %v585_v20 }
  0x75   :  { %544 = vmatprep.subr.bf16.mxu0 %v717_v0 }
  0x78   :  { %545 = vmatpush3.bf16.msra.mxu0 %v586_v30 }
  0x79   :  { %546 = vmatprep.subr.bf16.mxu0 %v717_v0 }
  0x7c   :  { %547 = vmatpush3.bf16.msra.mxu0 %v587_v31 }
  0x7d   :  { %548 = vmatprep.subr.bf16.mxu0 %v717_v0 }
  0x80   :  { %549 = vmatpush3.bf16.msra.mxu0 %v588_v32 }
  0x81   :  { %550 = vmatprep.subr.bf16.mxu0 %v717_v0 }
  0x84   :  { %551 = vmatpush3.bf16.msra.mxu0 %v589_v33 }
  0x85   :  { %552 = vmatprep.subr.bf16.mxu0 %v717_v0 }
  0x88   :  { %553 = vmatpush3.bf16.msra.mxu0 %v590_v34 }
 0x13e   :  { %v187_v22 = vpop.f32.mrb[0].mxu0 }
 0x13f   :  { %v188_v23 = vadd.f32 %v444_v21, %v187_v22  ;;  %v516_v24 = vpop.f32.mrb[1].mxu0 }
 0x140   :  { %v190_v25 = vpop.f32.mrb[2].mxu0 }
 0x141   :  { %vm193_vm1 = vcmp.ge.f32.partialorder %v188_v23, 0.0  ;;  %v194_v26 = vmul.f32 0.01, %v188_v23  ;;  %v517_v27 = vpop.f32.mrb[3].mxu0 }
 0x143   :  { %v195_v28 = vsel %vm193_vm1, %v188_v23, %v194_v26 }
 0x144   :  { %v213_v29 = vpack.c.bf16 %v195_v28, %v195_v28 }
 0x146   :  { %535 = vmatmul.mubr.bf16.vlgmr.msra.gmra.mrb[0].mxu1 %v213_v29 }
 0x219   :  { %v302_v36 = vpop.f32.mrb[0].mxu1 }
 0x21a   :  { %v303_v37 = vadd.f32 %v453_v35, %v302_v36  ;;  %v536_v38 = vpop.f32.mrb[1].mxu1 }
 0x21b   :  { %v305_v39 = vpop.f32.mrb[2].mxu1 }
 0x21c   :  { %vm308_vm2 = vcmp.ge.f32.partialorder %v303_v37, 0.0  ;;  %v309_v40 = vmul.f32 0.01, %v303_v37  ;;  %v537_v41 = vpop.f32.mrb[3].mxu1 }
 0x21e   :  { %v310_v42 = vsel %vm308_vm2, %v303_v37, %v309_v40 }
 0x21f   :  { %v311_v43 = vadd.f32 %v310_v42, %v195_v28 }
 0x221   :  { %591 = vtanh.f32 %v311_v43 }
 0x22b   :  { %v592_v44 = vpop.eup %591 }
 0x22c   :  { %v330_v45 = vpack.c.bf16 %v592_v44, %v592_v44 }
 0x22e   :  { %555 = vmatmul.mubr.bf16.vlgmr.msra.gmra.mrb[4].mxu0 %v330_v45 }
 0x301   :  { %v419_v47 = vpop.f32.mrb[4].mxu0 }
 0x302   :  { %v420_v48 = vadd.f32 %v462_v46, %v419_v47  ;;  %v556_v49 = vpop.f32.mrb[5].mxu0 }
 0x303   :  { %v422_v50 = vpop.f32.mrb[6].mxu0 }
 0x304   :  { %v425_v51 = vpack.c.bf16 %v420_v48, %v420_v48  ;;  %v557_v52 = vpop.f32.mrb[7].mxu0 }
 0x306   :  { %426 = vst [vmem:[#allocation10] sm:$0xf] %v425_v51 }
 0x307   :  { %692 = shalt.err (!%p689_p8)
}
 0x308   :  { %s693_s6 = scalar_lea.hbm %s875_s7, 64 }
 0x309   :  { %p694_p9 = scmp.ne.s32.totalorder %s875_s7, %s693_s6  ;;  %p697_p10 = scmp.lt.u32.totalorder %s693_s6, %s875_s7 }
 0x30b   :  { %p699_p11 = pnand %p697_p10, %p694_p9 }
 0x30d   :  { %702 = shalt.err (!%p699_p11)
}
 0x30e   :  { %436 = dma.vmem_to_hbm [thread:$0]  %s434_s4, 64, %s875_s7, [#allocation4]  }
 0x30f   :  { %709 = dma.done.wait [#allocation4], 64  }
 0x310   :  { %710 = vsyncadd [#allocation4], 4294967232 }
 0x311   :  { %440 = vsyncpa [#allocation3], 1 }
 0x312   :  { %441 = vsyncpa [#allocation6], 1 }
 0x313   :  { %442 = vsyncpa [#allocation9], 1 }
 0x314   :  { %443 = vsyncpa [#allocation4], 1 }

// kernel: tpu_custom_call.1
= control target key start
LH: loop header
LB: loop body
LE: loop exit
PB: predicated region body
PF: predicated region fallthrough
CT: control target
= control target key end

     0   :  { %12 = vsyncpa [#allocation3], 0  ;;  %s868_s0 = inlined_call_operand.hbm [shape: bf16[8,128], index: 0, kind: input, shape index: {}]   ;;  %s869_s1 = inlined_call_operand.hbm [shape: bf16[128,128], index: 1, kind: input, shape index: {}]   ;;  %s870_s2 = inlined_call_operand.vmem [shape: f32[1,128], index: 2, kind: input, shape index: {}]   ;;  %s871_s3 = inlined_call_operand.hbm [shape: bf16[128,128], index: 3, kind: input, shape index: {}]   ;;  %s872_s4 = inlined_call_operand.vmem [shape: f32[1,128], index: 4, kind: input, shape index: {}]   ;;  %s873_s5 = inlined_call_operand.hbm [shape: bf16[128,128], index: 5, kind: input, shape index: {}]   ;;  %s874_s6 = inlined_call_operand.vmem [shape: f32[1,128], index: 6, kind: input, shape index: {}]   ;;  %s875_s7 = inlined_call_operand.hbm [shape: bf16[8,128], index: 7, kind: output, shape index: {}]  }
   0x1   :  { %13 = vsyncpa [#allocation6], 0 }
   0x2   :  { %14 = vsyncpa [#allocation9], 0 }
   0x3   :  { %15 = vsyncpa [#allocation4], 0  ;;  %s711_s24 = smov [#allocation5]   ;;  %s593_s28 = scalar_lea.hbm %s869_s1, 1024 }
   0x4   :  { %s31_s25 = sshll.u32 %s711_s24, 4  ;;  %p594_p0 = scmp.ne.s32.totalorder %s869_s1, %s593_s28  ;;  %s32_s25 = int_to_ptr.vmem [resolvable:$true] %s31_s25 }
   0x5   :  { %p597_p1 = scmp.lt.u32.totalorder %s593_s28, %s869_s1 }
   0x7   :  { %p599_p2 = pnand %p597_p1, %p594_p0 }
   0x9   :  { %602 = shalt.err (!%p599_p2)
}
   0xa   :  { %s603_s10 = scalar_lea.vmem %s32_s25, 1024  ;;  %p608_p4 = scmp.lt.s32.totalorder %s32_s25, %s32_s25 }
   0xb   :  { %p604_p3 = scmp.ne.s32.totalorder %s32_s25, %s603_s10  ;;  %p609_p5 = scmp.lt.s32.totalorder %s603_s10, %s603_s10 }
   0xd   :  { %p610_p6 = por %p609_p5, %p608_p4 }
   0xf   :  { %p611_p7 = pnand %p610_p6, %p604_p3 }
  0x11   :  { %614 = shalt.err (!%p611_p7)
}
  0x12   :  { %s712_s11 = smov 64   ;;  %s713_s12 = smov 4  }
  0x13   :  { %37 = dma.hbm_to_vmem [thread:$0]  %s869_s1, 1024, %s32_s25, [#allocation6], %s712_s11, %s712_s11, %s713_s12  }
  0x14   :  { %s714_s15 = smov [#allocation2]   ;;  %s715_s17 = smov [#allocation7]  }
  0x15   :  { %s22_s16 = sshll.u32 %s714_s15, 4  ;;  %s45_s18 = sshll.u32 %s715_s17, 4  ;;  %s23_s16 = int_to_ptr.vmem [resolvable:$true] %s22_s16  ;;  %s46_s18 = int_to_ptr.vmem [resolvable:$true] %s45_s18 }
  0x16   :  { %s615_s21 = scalar_lea.hbm %s868_s0, 64 }
  0x17   :  { %p616_p8 = scmp.ne.s32.totalorder %s868_s0, %s615_s21  ;;  %p619_p9 = scmp.lt.u32.totalorder %s615_s21, %s868_s0 }
  0x19   :  { %p621_p10 = pnand %p619_p9, %p616_p8 }
  0x1b   :  { %624 = shalt.err (!%p621_p10)
}
  0x1c   :  { %s625_s1 = scalar_lea.vmem %s23_s16, 64  ;;  %p630_p12 = scmp.lt.s32.totalorder %s23_s16, %s23_s16 }
  0x1d   :  { %p626_p11 = scmp.ne.s32.totalorder %s23_s16, %s625_s1  ;;  %p631_p13 = scmp.lt.s32.totalorder %s625_s1, %s625_s1 }
  0x1f   :  { %p632_p0 = por %p631_p13, %p630_p12 }
  0x21   :  { %p633_p1 = pnand %p632_p0, %p626_p11 }
  0x23   :  { %636 = shalt.err (!%p633_p1)
}
  0x24   :  { %25 = dma.hbm_to_vmem [thread:$0]  %s868_s0, 64, %s23_s16, [#allocation3]  }
  0x25   :  { %s637_s30 = scalar_lea.hbm %s871_s3, 1024 }
  0x26   :  { %p638_p2 = scmp.ne.s32.totalorder %s871_s3, %s637_s30  ;;  %p641_p3 = scmp.lt.u32.totalorder %s637_s30, %s871_s3 }
  0x28   :  { %p643_p4 = pnand %p641_p3, %p638_p2 }
  0x2a   :  { %646 = shalt.err (!%p643_p4)
}
  0x2b   :  { %s647_s14 = scalar_lea.vmem %s46_s18, 1024  ;;  %p652_p6 = scmp.lt.s32.totalorder %s46_s18, %s46_s18 }
  0x2c   :  { %p648_p5 = scmp.ne.s32.totalorder %s46_s18, %s647_s14  ;;  %p653_p7 = scmp.lt.s32.totalorder %s647_s14, %s647_s14 }
  0x2e   :  { %p654_p8 = por %p653_p7, %p652_p6 }
  0x30   :  { %p655_p9 = pnand %p654_p8, %p648_p5 }
  0x32   :  { %658 = shalt.err (!%p655_p9)
}
  0x33   :  { %51 = dma.hbm_to_vmem [thread:$0]  %s871_s3, 1024, %s46_s18, [#allocation6], %s712_s11, %s712_s11, %s713_s12  }
  0x34   :  { %s716_s16 = smov [#allocation8]   ;;  %s659_s21 = scalar_lea.hbm %s873_s5, 1024 }
  0x35   :  { %s59_s17 = sshll.u32 %s716_s16, 4  ;;  %p660_p10 = scmp.ne.s32.totalorder %s873_s5, %s659_s21  ;;  %s60_s17 = int_to_ptr.vmem [resolvable:$true] %s59_s17 }
  0x36   :  { %p663_p11 = scmp.lt.u32.totalorder %s659_s21, %s873_s5 }
  0x38   :  { %p665_p12 = pnand %p663_p11, %p660_p10 }
  0x3a   :  { %668 = shalt.err (!%p665_p12)
}
  0x3b   :  { %s669_s1 = scalar_lea.vmem %s60_s17, 1024  ;;  %p674_p0 = scmp.lt.s32.totalorder %s60_s17, %s60_s17 }
  0x3c   :  { %p670_p13 = scmp.ne.s32.totalorder %s60_s17, %s669_s1  ;;  %p675_p1 = scmp.lt.s32.totalorder %s669_s1, %s669_s1 }
  0x3e   :  { %p676_p2 = por %p675_p1, %p674_p0 }
  0x40   :  { %p677_p3 = pnand %p676_p2, %p670_p13 }
  0x42   :  { %680 = shalt.err (!%p677_p3)
}
  0x43   :  { %65 = dma.hbm_to_vmem [thread:$0]  %s873_s5, 1024, %s60_s17, [#allocation9], %s712_s11, %s712_s11, %s713_s12  }
  0x44   :  { %703 = dma.done.wait [#allocation3], 64  }
  0x45   :  { %704 = vsyncadd [#allocation3], 4294967232 }
  0x46   :  { %705 = dma.done.wait [#allocation6], 2048  }
  0x47   :  { %706 = vsyncadd [#allocation6], 4294965248 }
  0x48   :  { %707 = dma.done.wait [#allocation9], 1024  }
  0x49   :  { %708 = vsyncadd [#allocation9], 4294966272  ;;  %v717_v0 = vmov 0.0   ;;  %vm718_vm0 = vmmov 0   ;;  %v567_v1 = vld [vmem:[#allocation5] sm:$0xff]   ;;  %v568_v2 = vld [vmem:[#allocation5 + $0x8] sm:$0xff]  }
  0x4a   :  { %498 = vmatprep.subr.bf16.mxu0 %v717_v0  ;;  %514 = vmatprep.mubr.msk.bf16.mxu0 %vm718_vm0, %v717_v0  ;;  %v569_v3 = vld [vmem:[#allocation5 + $0x10] sm:$0xff]   ;;  %v575_v4 = vld [vmem:[#allocation7] sm:$0xff]   ;;  %v570_v5 = vld [vmem:[#allocation5 + $0x18] sm:$0xff]   ;;  %s719_s28 = smov [#allocation10]  }
  0x4b   :  { %518 = vmatprep.subr.bf16.mxu1 %v717_v0  ;;  %534 = vmatprep.mubr.msk.bf16.mxu1 %vm718_vm0, %v717_v0  ;;  %v576_v6 = vld [vmem:[#allocation7 + $0x8] sm:$0xff]   ;;  %v571_v7 = vld [vmem:[#allocation5 + $0x20] sm:$0xff]   ;;  %v577_v8 = vld [vmem:[#allocation7 + $0x10] sm:$0xff]  }
  0x4c   :  { %499 = vmatpush3.bf16.msra.mxu0 %v567_v1  ;;  %519 = vmatpush3.bf16.msra.mxu1 %v575_v4  ;;  %v572_v9 = vld [vmem:[#allocation5 + $0x28] sm:$0xff]   ;;  %v578_v10 = vld [vmem:[#allocation7 + $0x18] sm:$0xff]   ;;  %v573_v11 = vld [vmem:[#allocation5 + $0x30] sm:$0xff]  }
  0x4d   :  { %500 = vmatprep.subr.bf16.mxu0 %v717_v0  ;;  %520 = vmatprep.subr.bf16.mxu1 %v717_v0  ;;  %v579_v12 = vld [vmem:[#allocation7 + $0x20] sm:$0xff]   ;;  %v574_v13 = vld [vmem:[#allocation5 + $0x38] sm:$0xff]   ;;  %v580_v14 = vld [vmem:[#allocation7 + $0x28] sm:$0xff]  }
  0x4e   :  { %v81_v15 = vld [vmem:[#allocation2] sm:$0xf]  ;;  %v581_v16 = vld [vmem:[#allocation7 + $0x30] sm:$0xff]   ;;  %v583_v18 = vld [vmem:[#allocation8] sm:$0xff]  }
  0x4f   :  { %v582_v17 = vld [vmem:[#allocation7 + $0x38] sm:$0xff]   ;;  %v584_v19 = vld [vmem:[#allocation8 + $0x8] sm:$0xff]   ;;  %v585_v20 = vld [vmem:[#allocation8 + $0x10] sm:$0xff]  }
  0x50   :  { %501 = vmatpush3.bf16.msra.mxu0 %v568_v2  ;;  %521 = vmatpush3.bf16.msra.mxu1 %v576_v6  ;;  %v444_v21 = vld [vmem:[%s870_s2] ss:$0 sm:$0xff]  ;;  %v587_v31 = vld [vmem:[#allocation8 + $0x20] sm:$0xff]   ;;  %v588_v32 = vld [vmem:[#allocation8 + $0x28] sm:$0xff]  }
  0x51   :  { %502 = vmatprep.subr.bf16.mxu0 %v717_v0  ;;  %522 = vmatprep.subr.bf16.mxu1 %v717_v0  ;;  %v586_v30 = vld [vmem:[#allocation8 + $0x18] sm:$0xff]   ;;  %v589_v33 = vld [vmem:[#allocation8 + $0x30] sm:$0xff]  }
  0x52   :  { %v590_v34 = vld [vmem:[#allocation8 + $0x38] sm:$0xff]  }
  0x53   :  { %v453_v35 = vld [vmem:[%s872_s4] ss:$0 sm:$0xff]  ;;  %s433_s4 = sshll.u32 %s719_s28, 4  ;;  %s434_s4 = int_to_ptr.vmem [resolvable:$true] %s433_s4 }
  0x54   :  { %503 = vmatpush3.bf16.msra.mxu0 %v569_v3  ;;  %523 = vmatpush3.bf16.msra.mxu1 %v577_v8  ;;  %v462_v46 = vld [vmem:[%s874_s6] ss:$0 sm:$0xff]  ;;  %s681_s29 = scalar_lea.vmem %s434_s4, 64  ;;  %p686_p5 = scmp.lt.s32.totalorder %s434_s4, %s434_s4 }
  0x55   :  { %504 = vmatprep.subr.bf16.mxu0 %v717_v0  ;;  %524 = vmatprep.subr.bf16.mxu1 %v717_v0  ;;  %p682_p4 = scmp.ne.s32.totalorder %s434_s4, %s681_s29  ;;  %p687_p6 = scmp.lt.s32.totalorder %s681_s29, %s681_s29 }
  0x57   :  { %p688_p7 = por %p687_p6, %p686_p5 }
  0x58   :  { %505 = vmatpush3.bf16.msra.mxu0 %v570_v5  ;;  %525 = vmatpush3.bf16.msra.mxu1 %v578_v10 }
  0x59   :  { %506 = vmatprep.subr.bf16.mxu0 %v717_v0  ;;  %526 = vmatprep.subr.bf16.mxu1 %v717_v0  ;;  %p689_p8 = pnand %p688_p7, %p682_p4 }
  0x5c   :  { %507 = vmatpush3.bf16.msra.mxu0 %v571_v7  ;;  %527 = vmatpush3.bf16.msra.mxu1 %v579_v12 }
  0x5d   :  { %508 = vmatprep.subr.bf16.mxu0 %v717_v0  ;;  %528 = vmatprep.subr.bf16.mxu1 %v717_v0 }
  0x60   :  { %509 = vmatpush3.bf16.msra.mxu0 %v572_v9  ;;  %529 = vmatpush3.bf16.msra.mxu1 %v580_v14 }
  0x61   :  { %510 = vmatprep.subr.bf16.mxu0 %v717_v0  ;;  %530 = vmatprep.subr.bf16.mxu1 %v717_v0 }
  0x64   :  { %511 = vmatpush3.bf16.msra.mxu0 %v573_v11  ;;  %531 = vmatpush3.bf16.msra.mxu1 %v581_v16 }
  0x65   :  { %512 = vmatprep.subr.bf16.mxu0 %v717_v0  ;;  %532 = vmatprep.subr.bf16.mxu1 %v717_v0 }
  0x68   :  { %513 = vmatpush3.bf16.msra.mxu0 %v574_v13  ;;  %533 = vmatpush3.bf16.msra.mxu1 %v582_v17 }
  0x69   :  { %538 = vmatprep.subr.bf16.mxu0 %v717_v0 }
  0x6b   :  { %515 = vmatmul.mubr.bf16.vlgmr.msra.gmra.mrb[0].mxu0 %v81_v15 }
  0x6c   :  { %554 = vmatprep.mubr.msk.bf16.mxu0 %vm718_vm0, %v717_v0  ;;  %539 = vmatpush3.bf16.msra.mxu0 %v583_v18 }
  0x6d   :  { %540 = vmatprep.subr.bf16.mxu0 %v717_v0 }
  0x70   :  { %541 = vmatpush3.bf16.msra.mxu0 %v584_v19 }
  0x71   :  { %542 = vmatprep.subr.bf16.mxu0 %v717_v0 }
  0x74   :  { %543 = vmatpush3.bf16.msra.mxu0 %v585_v20 }
  0x75   :  { %544 = vmatprep.subr.bf16.mxu0 %v717_v0 }
  0x78   :  { %545 = vmatpush3.bf16.msra.mxu0 %v586_v30 }
  0x79   :  { %546 = vmatprep.subr.bf16.mxu0 %v717_v0 }
  0x7c   :  { %547 = vmatpush3.bf16.msra.mxu0 %v587_v31 }
  0x7d   :  { %548 = vmatprep.subr.bf16.mxu0 %v717_v0 }
  0x80   :  { %549 = vmatpush3.bf16.msra.mxu0 %v588_v32 }
  0x81   :  { %550 = vmatprep.subr.bf16.mxu0 %v717_v0 }
  0x84   :  { %551 = vmatpush3.bf16.msra.mxu0 %v589_v33 }
  0x85   :  { %552 = vmatprep.subr.bf16.mxu0 %v717_v0 }
  0x88   :  { %553 = vmatpush3.bf16.msra.mxu0 %v590_v34 }
 0x13e   :  { %v187_v22 = vpop.f32.mrb[0].mxu0 }
 0x13f   :  { %v188_v23 = vadd.f32 %v444_v21, %v187_v22  ;;  %v516_v24 = vpop.f32.mrb[1].mxu0 }
 0x140   :  { %v190_v25 = vpop.f32.mrb[2].mxu0 }
 0x141   :  { %vm193_vm1 = vcmp.ge.f32.partialorder %v188_v23, 0.0  ;;  %v194_v26 = vmul.f32 0.01, %v188_v23  ;;  %v517_v27 = vpop.f32.mrb[3].mxu0 }
 0x143   :  { %v195_v28 = vsel %vm193_vm1, %v188_v23, %v194_v26 }
 0x144   :  { %v213_v29 = vpack.c.bf16 %v195_v28, %v195_v28 }
 0x146   :  { %535 = vmatmul.mubr.bf16.vlgmr.msra.gmra.mrb[0].mxu1 %v213_v29 }
 0x219   :  { %v302_v36 = vpop.f32.mrb[0].mxu1 }
 0x21a   :  { %v303_v37 = vadd.f32 %v453_v35, %v302_v36  ;;  %v536_v38 = vpop.f32.mrb[1].mxu1 }
 0x21b   :  { %v305_v39 = vpop.f32.mrb[2].mxu1 }
 0x21c   :  { %vm308_vm2 = vcmp.ge.f32.partialorder %v303_v37, 0.0  ;;  %v309_v40 = vmul.f32 0.01, %v303_v37  ;;  %v537_v41 = vpop.f32.mrb[3].mxu1 }
 0x21e   :  { %v310_v42 = vsel %vm308_vm2, %v303_v37, %v309_v40 }
 0x21f   :  { %v311_v43 = vadd.f32 %v310_v42, %v195_v28 }
 0x221   :  { %591 = vtanh.f32 %v311_v43 }
 0x22b   :  { %v592_v44 = vpop.eup %591 }
 0x22c   :  { %v330_v45 = vpack.c.bf16 %v592_v44, %v592_v44 }
 0x22e   :  { %555 = vmatmul.mubr.bf16.vlgmr.msra.gmra.mrb[4].mxu0 %v330_v45 }
 0x301   :  { %v419_v47 = vpop.f32.mrb[4].mxu0 }
 0x302   :  { %v420_v48 = vadd.f32 %v462_v46, %v419_v47  ;;  %v556_v49 = vpop.f32.mrb[5].mxu0 }
 0x303   :  { %v422_v50 = vpop.f32.mrb[6].mxu0 }
 0x304   :  { %v425_v51 = vpack.c.bf16 %v420_v48, %v420_v48  ;;  %v557_v52 = vpop.f32.mrb[7].mxu0 }
 0x306   :  { %426 = vst [vmem:[#allocation10] sm:$0xf] %v425_v51 }
 0x307   :  { %692 = shalt.err (!%p689_p8)
}
 0x308   :  { %s693_s6 = scalar_lea.hbm %s875_s7, 64 }
 0x309   :  { %p694_p9 = scmp.ne.s32.totalorder %s875_s7, %s693_s6  ;;  %p697_p10 = scmp.lt.u32.totalorder %s693_s6, %s875_s7 }
 0x30b   :  { %p699_p11 = pnand %p697_p10, %p694_p9 }
 0x30d   :  { %702 = shalt.err (!%p699_p11)
}
 0x30e   :  { %436 = dma.vmem_to_hbm [thread:$0]  %s434_s4, 64, %s875_s7, [#allocation4]  }
 0x30f   :  { %709 = dma.done.wait [#allocation4], 64  }
 0x310   :  { %710 = vsyncadd [#allocation4], 4294967232 }
 0x311   :  { %440 = vsyncpa [#allocation3], 1 }
 0x312   :  { %441 = vsyncpa [#allocation6], 1 }
 0x313   :  { %442 = vsyncpa [#allocation9], 1 }
 0x314   :  { %443 = vsyncpa [#allocation4], 1 }

</bundles_post_ra>
